<compile_context>
chip_gen: v7x
topology: tpu7x:2x2x1
jax: 0.10.0
libtpu: 0.0.40
codegen_flags: <defaults>
</compile_context>

<pallas_src>
import functools

import jax
import jax.numpy as jnp
from jax.experimental import pallas as pl
from jax.experimental.pallas import tpu as pltpu


# ----------------------------------------------------------------------------
# Fused kernel: SSD match + encode + smooth-L1 + per-box cross-entropy
# ----------------------------------------------------------------------------
def _multibox_kernel(truths6_ref, truthsT_ref, dbf_ref, loc_ref, conf_ref,
                     out_ref, *, thresh, inv_var1):
    t6 = truths6_ref[0]            # (O, 6)
    tT = truthsT_ref[0]            # (8, O)  rows: xmin,ymin,xmax,ymax,label,valid,0,0
    dbf = dbf_ref[...]             # (16, D)

    O = t6.shape[0]
    D = dbf.shape[1]

    t_xmin = t6[:, 0:1]
    t_ymin = t6[:, 1:2]
    t_xmax = t6[:, 2:3]
    t_ymax = t6[:, 3:4]
    valid = t6[:, 5:6]             # 1.0 real object, 0.0 padding

    d_cx = dbf[0:1]
    d_cy = dbf[1:2]
    d_xmin = dbf[4:5]
    d_ymin = dbf[5:6]
    d_xmax = dbf[6:7]
    d_ymax = dbf[7:8]
    area_d = dbf[8:9]
    inv_v0w = dbf[9:10]            # 1 / (var0 * w)
    inv_v0h = dbf[10:11]           # 1 / (var0 * h)
    log_dw = dbf[11:12]
    log_dh = dbf[12:13]

    # Jaccard (IoU) matrix (O, D).  Division moved to the EUP.
    ix = jnp.maximum(t_xmin, d_xmin)
    iy = jnp.maximum(t_ymin, d_ymin)
    ax = jnp.minimum(t_xmax, d_xmax)
    ay = jnp.minimum(t_ymax, d_ymax)
    inter = jnp.maximum(ax - ix, 0.0) * jnp.maximum(ay - iy, 0.0)
    area_t = (t_xmax - t_xmin) * (t_ymax - t_ymin)               # (O, 1)
    union = area_t + area_d - inter
    iou = inter * pl.reciprocal(union, approx=True)
    iou = jnp.where(valid > 0, iou, -1.0)                        # mask padded objects

    idx_d = jax.lax.broadcasted_iota(jnp.int32, (O, D), 1)
    idx_o = jax.lax.broadcasted_iota(jnp.int32, (O, D), 0)

    # best prior per truth
    bp_ovr = jnp.max(iou, axis=1, keepdims=True)                              # (O, 1)
    bp_idx = jnp.min(jnp.where(iou == bp_ovr, idx_d, D), axis=1, keepdims=True)

    # best truth per prior
    bt_ovr = jnp.max(iou, axis=0, keepdims=True)                              # (1, D)
    bt_idx = jnp.min(jnp.where(iou == bt_ovr, idx_o, O), axis=0, keepdims=True)

    # force each truth's best prior to keep that truth (overlap := 2)
    forced = jnp.logical_and(bp_idx == idx_d, valid > 0)                      # (O, D)
    forced_any = jnp.max(forced.astype(jnp.int32), axis=0, keepdims=True) > 0
    forced_j = jnp.max(jnp.where(forced, idx_o, -1), axis=0, keepdims=True)
    bt_idx = jnp.where(forced_any, forced_j, bt_idx)
    bt_ovr = jnp.where(forced_any, 2.0, bt_ovr)

    # gather matched truth box / label with a single MXU matmul:
    # (8, O) @ (O, D) -> (8, D)   (rows 0..3 = coords, row 4 = label)
    onehot = (idx_o == bt_idx).astype(jnp.float32)                            # (O, D)
    matched = jnp.dot(tT, onehot, preferred_element_type=jnp.float32)         # (8, D)
    m_xmin = matched[0:1]
    m_ymin = matched[1:2]
    m_xmax = matched[2:3]
    m_ymax = matched[3:4]
    m_lab = matched[4:5]

    conf_f = jnp.where(bt_ovr < thresh, 0.0, m_lab + 1.0)                     # (1, D)
    lab_i = conf_f.astype(jnp.int32)
    pos = lab_i > 0

    # encode (SSD offsets with variances); dbox-derived constants precomputed.
    g_cx = 0.5 * (m_xmin + m_xmax)
    g_cy = 0.5 * (m_ymin + m_ymax)
    g_w = jnp.maximum(m_xmax - m_xmin, 1e-10)   # guard log(0) for degenerate matches
    g_h = jnp.maximum(m_ymax - m_ymin, 1e-10)
    e_cx = (g_cx - d_cx) * inv_v0w
    e_cy = (g_cy - d_cy) * inv_v0h
    e_w = (jnp.log(g_w) - log_dw) * inv_var1
    e_h = (jnp.log(g_h) - log_dh) * inv_var1
    loc_t = jnp.concatenate([e_cx, e_cy, e_w, e_h], axis=0)                   # (4, D)

    # smooth-L1 on positives
    lp = loc_ref[0]                                                           # (4, D)
    dlt = lp - loc_t
    ad = jnp.abs(dlt)
    sl1 = jnp.where(ad < 1.0, 0.5 * dlt * dlt, ad - 0.5)
    l1_box = jnp.sum(sl1, axis=0, keepdims=True)                              # (1, D)
    l1_pos = jnp.where(pos, l1_box, 0.0)

    # per-box cross-entropy (class-major conf)
    conf = conf_ref[0]                                                        # (C, D)
    m = jnp.max(conf, axis=0, keepdims=True)
    sexp = jnp.sum(jnp.exp(conf - m), axis=0, keepdims=True)
    lse = m + jnp.log(sexp)
    cls = jax.lax.broadcasted_iota(jnp.int32, conf.shape, 0)
    oh_c = (cls == lab_i).astype(conf.dtype)
    picked = jnp.sum(conf * oh_c, axis=0, keepdims=True)
    ce = lse - picked

    out_ref[0] = jnp.concatenate([l1_pos, ce, conf_f], axis=0)                # (3, D)


def _multibox_call(truths6, truthsT, dbox_feats, loc_km, conf_km, thresh):
    B, O, _ = truths6.shape
    C, D = conf_km.shape[1], conf_km.shape[2]
    kernel = functools.partial(_multibox_kernel, thresh=thresh, inv_var1=1.0 / 0.2)
    return pl.pallas_call(
        kernel,
        out_shape=jax.ShapeDtypeStruct((B, 3, D), jnp.float32),
        grid_spec=pltpu.PrefetchScalarGridSpec(
            num_scalar_prefetch=0,
            grid=(B,),
            in_specs=[
                pl.BlockSpec((1, O, 6), lambda b: (b, 0, 0)),
                pl.BlockSpec((1, 8, O), lambda b: (b, 0, 0)),
                pl.BlockSpec((16, D), lambda b: (0, 0)),
                pl.BlockSpec((1, 4, D), lambda b: (b, 0, 0)),
                pl.BlockSpec((1, C, D), lambda b: (b, 0, 0)),
            ],
            out_specs=pl.BlockSpec((1, 3, D), lambda b: (b, 0, 0)),
        ),
        compiler_params=pltpu.CompilerParams(dimension_semantics=("parallel",)),
    )(truths6, truthsT, dbox_feats, loc_km, conf_km)


# ----------------------------------------------------------------------------
# Wrapper reproducing MultiBoxLoss.forward
# ----------------------------------------------------------------------------
def multibox_loss(loc_data, conf_data, dbox_list, targets, valid,
                  jaccard_thresh=0.5, negpos_ratio=3):
    """loc_data (B,D,4), conf_data (B,D,C), dbox_list (D,4) [cx,cy,w,h],
    targets (B,O,5) [xmin,ymin,xmax,ymax,label], valid (B,O) 0/1 mask."""
    B, D, C = conf_data.shape
    O = targets.shape[1]

    # ---- pad D (priors) up to a multiple of 128 for lane-dense tiles ----------
    D_pad = ((D + 127) // 128) * 128
    dbox = dbox_list.astype(jnp.float32)
    if D_pad > D:
        # padded priors: tiny boxes far outside the image -> IoU 0, never positive
        pad_boxes = jnp.concatenate(
            [jnp.full((D_pad - D, 2), 2.0, jnp.float32),
             jnp.full((D_pad - D, 2), 1e-3, jnp.float32)], axis=1)
        dbox = jnp.concatenate([dbox, pad_boxes], axis=0)
        loc_data = jnp.pad(loc_data, ((0, 0), (0, D_pad - D), (0, 0)))
        conf_data = jnp.pad(conf_data, ((0, 0), (0, D_pad - D), (0, 0)))

    # ---- pad O (objects) up to a multiple of 8 --------------------------------
    O_pad = max(8, ((O + 7) // 8) * 8)
    truths = targets[..., :4].astype(jnp.float32)                  # (B, O, 4)
    labels = targets[..., 4].astype(jnp.float32)                   # (B, O)
    valid_f = valid.astype(jnp.float32)                            # (B, O)
    if O_pad > O:
        truths = jnp.pad(truths, ((0, 0), (0, O_pad - O), (0, 0)))
        labels = jnp.pad(labels, ((0, 0), (0, O_pad - O)))
        valid_f = jnp.pad(valid_f, ((0, 0), (0, O_pad - O)))

    truths6 = jnp.concatenate(
        [truths, labels[..., None], valid_f[..., None]], axis=-1)  # (B, O_pad, 6)
    truthsT = jnp.concatenate(
        [jnp.transpose(truths, (0, 2, 1)),                         # (B, 4, O_pad)
         labels[:, None, :], valid_f[:, None, :],
         jnp.zeros((B, 2, O_pad), jnp.float32)], axis=1)           # (B, 8, O_pad)

    # ---- default-box features, computed ONCE (hoisted out of the batch loop) --
    cx, cy, w, h = dbox[:, 0], dbox[:, 1], dbox[:, 2], dbox[:, 3]
    xmin = cx - 0.5 * w
    ymin = cy - 0.5 * h
    xmax = cx + 0.5 * w
    ymax = cy + 0.5 * h
    zeros = jnp.zeros_like(cx)
    dbox_feats = jnp.stack(
        [cx, cy, w, h, xmin, ymin, xmax, ymax, w * h,
         1.0 / (0.1 * w), 1.0 / (0.1 * h), jnp.log(w), jnp.log(h),
         zeros, zeros, zeros], axis=0).astype(jnp.float32)         # (16, D_pad)

    loc_km = jnp.transpose(loc_data, (0, 2, 1)).astype(jnp.float32)    # (B, 4, D_pad)
    conf_km = jnp.transpose(conf_data, (0, 2, 1)).astype(jnp.float32)  # (B, C, D_pad)

    out = _multibox_call(truths6, truthsT, dbox_feats, loc_km, conf_km,
                         jaccard_thresh)                            # (B, 3, D_pad)
    l1 = out[:, 0, :D]                                              # (B, D)
    ce = out[:, 1, :D]                                              # (B, D)
    conf_t = out[:, 2, :D]                                          # (B, D) float label

    pos = conf_t > 0.5
    num_pos = jnp.sum(pos.astype(jnp.int32), axis=1, keepdims=True)  # (B, 1)

    loss_l = jnp.sum(l1)

    # Hard-negative mining: the sum over the top-num_neg CE values equals the
    # reference double-argsort selection exactly (ties contribute equal values).
    # TODO(synk): ranked selection has no clean Pallas equivalent; done in JAX glue.
    ce_z = jnp.where(pos, 0.0, ce)
    sorted_desc = -jnp.sort(-ce_z, axis=1)                          # descending
    csum = jnp.cumsum(sorted_desc, axis=1)
    num_neg = jnp.minimum(num_pos * negpos_ratio, D)                # (B, 1)
    idx = jnp.clip(num_neg - 1, 0, D - 1)
    neg_sum = jnp.take_along_axis(csum, idx, axis=1)
    neg_sum = jnp.where(num_neg > 0, neg_sum, 0.0)
    loss_c = jnp.sum(jnp.where(pos, ce, 0.0)) + jnp.sum(neg_sum)

    # clamp N to avoid NaN when there are no positives (reference would produce inf)
    N = jnp.maximum(jnp.sum(num_pos), 1).astype(jnp.float32)
    return loss_l / N, loss_c / N


if __name__ == "__main__":
    B, D, C, O = 2, 200, 21, 7   # batch, num default boxes, num classes, max objects

    key = jax.random.PRNGKey(0)
    k1, k2, k3, k4, k5, k6 = jax.random.split(key, 6)

    loc_data = 0.1 * jax.random.normal(k1, (B, D, 4), jnp.float32)
    conf_data = jax.random.normal(k2, (B, D, C), jnp.float32)

    d_cxcy = jax.random.uniform(k3, (D, 2), minval=0.1, maxval=0.9)
    d_wh = jax.random.uniform(k4, (D, 2), minval=0.05, maxval=0.4)
    dbox = jnp.concatenate([d_cxcy, d_wh], axis=1)                 # (D, 4) [cx,cy,w,h]

    pts = jax.random.uniform(k5, (B, O, 2, 2), minval=0.0, maxval=1.0)
    mins = jnp.min(pts, axis=2)
    maxs = jnp.maximum(jnp.max(pts, axis=2), mins + 0.05)
    boxes = jnp.concatenate([mins, maxs], axis=-1)                 # (B, O, 4)
    labels = jax.random.randint(k6, (B, O), 0, C - 1).astype(jnp.float32)
    targets = jnp.concatenate([boxes, labels[..., None]], axis=-1)  # (B, O, 5)
    valid = jnp.ones((B, O), jnp.float32)

    loss_l, loss_c = multibox_loss(loc_data, conf_data, dbox, targets, valid)
    (loss_l, loss_c) = jax.block_until_ready((loss_l, loss_c))

    assert bool(jnp.isfinite(loss_l)) and bool(jnp.isfinite(loss_c))
    print("KERNEL_OK")
</pallas_src>

<mosaic_0001>
module attributes {stable_mosaic.version = 11 : i64} {
  func.func @_multibox_kernel(%arg0: i32, %arg1: memref<1x8x6xf32, #tpu.memory_space<vmem>>, %arg2: memref<1x8x8xf32, #tpu.memory_space<vmem>>, %arg3: memref<16x256xf32, #tpu.memory_space<vmem>>, %arg4: memref<1x4x256xf32, #tpu.memory_space<vmem>>, %arg5: memref<1x21x256xf32, #tpu.memory_space<vmem>>, %arg6: memref<1x3x256xf32, #tpu.memory_space<vmem>>) attributes {dimension_semantics = [#tpu.dimension_semantics<parallel>], iteration_bounds = array<i64: 2>, scalar_prefetch = 0 : i64, scratch_operands = 0 : i64, tpu.core_type = #tpu.core_type<tc>, window_params = [{transform_indices = @transform_0, window_bounds = array<i64: 1, 8, 6>}, {transform_indices = @transform_1, window_bounds = array<i64: 1, 8, 8>}, {pipeline_mode = #tpu.pipeline_mode<synchronous>, transform_indices = @transform_2, window_bounds = array<i64: 16, 256>}, {transform_indices = @transform_3, window_bounds = array<i64: 1, 4, 256>}, {transform_indices = @transform_4, window_bounds = array<i64: 1, 21, 256>}, {transform_indices = @transform_5, window_bounds = array<i64: 1, 3, 256>}]} {
    %c0 = arith.constant 0 : index
    %c0_0 = arith.constant 0 : index
    %c0_1 = arith.constant 0 : index
    %0 = vector.load %arg1[%c0, %c0_0, %c0_1] : memref<1x8x6xf32, #tpu.memory_space<vmem>>, vector<1x8x6xf32>
    %1 = vector.shape_cast %0 : vector<1x8x6xf32> to vector<8x6xf32>
    %c0_2 = arith.constant 0 : index
    %c0_3 = arith.constant 0 : index
    %c0_4 = arith.constant 0 : index
    %2 = vector.load %arg2[%c0_2, %c0_3, %c0_4] : memref<1x8x8xf32, #tpu.memory_space<vmem>>, vector<1x8x8xf32>
    %3 = vector.shape_cast %2 : vector<1x8x8xf32> to vector<8x8xf32>
    %c0_5 = arith.constant 0 : index
    %c0_6 = arith.constant 0 : index
    %4 = vector.load %arg3[%c0_5, %c0_6] : memref<16x256xf32, #tpu.memory_space<vmem>>, vector<16x256xf32>
    %5 = vector.extract_strided_slice %1 {offsets = [0, 0], sizes = [8, 1], strides = [1, 1]} : vector<8x6xf32> to vector<8x1xf32>
    %6 = vector.extract_strided_slice %1 {offsets = [0, 1], sizes = [8, 1], strides = [1, 1]} : vector<8x6xf32> to vector<8x1xf32>
    %7 = vector.extract_strided_slice %1 {offsets = [0, 2], sizes = [8, 1], strides = [1, 1]} : vector<8x6xf32> to vector<8x1xf32>
    %8 = vector.extract_strided_slice %1 {offsets = [0, 3], sizes = [8, 1], strides = [1, 1]} : vector<8x6xf32> to vector<8x1xf32>
    %9 = vector.extract_strided_slice %1 {offsets = [0, 5], sizes = [8, 1], strides = [1, 1]} : vector<8x6xf32> to vector<8x1xf32>
    %10 = vector.extract_strided_slice %4 {offsets = [0, 0], sizes = [1, 256], strides = [1, 1]} : vector<16x256xf32> to vector<1x256xf32>
    %11 = vector.extract_strided_slice %4 {offsets = [1, 0], sizes = [1, 256], strides = [1, 1]} : vector<16x256xf32> to vector<1x256xf32>
    %12 = vector.extract_strided_slice %4 {offsets = [4, 0], sizes = [1, 256], strides = [1, 1]} : vector<16x256xf32> to vector<1x256xf32>
    %13 = vector.extract_strided_slice %4 {offsets = [5, 0], sizes = [1, 256], strides = [1, 1]} : vector<16x256xf32> to vector<1x256xf32>
    %14 = vector.extract_strided_slice %4 {offsets = [6, 0], sizes = [1, 256], strides = [1, 1]} : vector<16x256xf32> to vector<1x256xf32>
    %15 = vector.extract_strided_slice %4 {offsets = [7, 0], sizes = [1, 256], strides = [1, 1]} : vector<16x256xf32> to vector<1x256xf32>
    %16 = vector.extract_strided_slice %4 {offsets = [8, 0], sizes = [1, 256], strides = [1, 1]} : vector<16x256xf32> to vector<1x256xf32>
    %17 = vector.extract_strided_slice %4 {offsets = [9, 0], sizes = [1, 256], strides = [1, 1]} : vector<16x256xf32> to vector<1x256xf32>
    %18 = vector.extract_strided_slice %4 {offsets = [10, 0], sizes = [1, 256], strides = [1, 1]} : vector<16x256xf32> to vector<1x256xf32>
    %19 = vector.extract_strided_slice %4 {offsets = [11, 0], sizes = [1, 256], strides = [1, 1]} : vector<16x256xf32> to vector<1x256xf32>
    %20 = vector.extract_strided_slice %4 {offsets = [12, 0], sizes = [1, 256], strides = [1, 1]} : vector<16x256xf32> to vector<1x256xf32>
    %21 = vector.broadcast %5 : vector<8x1xf32> to vector<8x256xf32>
    %22 = vector.broadcast %12 : vector<1x256xf32> to vector<8x256xf32>
    %23 = arith.maximumf %21, %22 : vector<8x256xf32>
    %24 = vector.broadcast %6 : vector<8x1xf32> to vector<8x256xf32>
    %25 = vector.broadcast %13 : vector<1x256xf32> to vector<8x256xf32>
    %26 = arith.maximumf %24, %25 : vector<8x256xf32>
    %27 = vector.broadcast %7 : vector<8x1xf32> to vector<8x256xf32>
    %28 = vector.broadcast %14 : vector<1x256xf32> to vector<8x256xf32>
    %29 = arith.minimumf %27, %28 : vector<8x256xf32>
    %30 = vector.broadcast %8 : vector<8x1xf32> to vector<8x256xf32>
    %31 = vector.broadcast %15 : vector<1x256xf32> to vector<8x256xf32>
    %32 = arith.minimumf %30, %31 : vector<8x256xf32>
    %33 = arith.subf %29, %23 : vector<8x256xf32>
    %cst = arith.constant 0.000000e+00 : f32
    %34 = vector.broadcast %cst : f32 to vector<8x256xf32>
    %35 = arith.maximumf %33, %34 : vector<8x256xf32>
    %36 = arith.subf %32, %26 : vector<8x256xf32>
    %cst_7 = arith.constant 0.000000e+00 : f32
    %37 = vector.broadcast %cst_7 : f32 to vector<8x256xf32>
    %38 = arith.maximumf %36, %37 : vector<8x256xf32>
    %39 = arith.mulf %35, %38 : vector<8x256xf32>
    %40 = arith.subf %7, %5 : vector<8x1xf32>
    %41 = arith.subf %8, %6 : vector<8x1xf32>
    %42 = arith.mulf %40, %41 : vector<8x1xf32>
    %43 = vector.broadcast %42 : vector<8x1xf32> to vector<8x256xf32>
    %44 = vector.broadcast %16 : vector<1x256xf32> to vector<8x256xf32>
    %45 = arith.addf %43, %44 : vector<8x256xf32>
    %46 = arith.subf %45, %39 : vector<8x256xf32>
    %47 = tpu.reciprocal %46 {approx = true} : vector<8x256xf32> -> vector<8x256xf32>
    %48 = arith.mulf %39, %47 : vector<8x256xf32>
    %cst_8 = arith.constant 0.000000e+00 : f32
    %49 = vector.broadcast %cst_8 : f32 to vector<8x1xf32>
    %50 = arith.cmpf ogt, %9, %49 : vector<8x1xf32>
    %cst_9 = arith.constant -1.000000e+00 : f32
    %51 = vector.shape_cast %50 : vector<8x1xi1> to vector<8x1xi1>
    %52 = vector.broadcast %51 : vector<8x1xi1> to vector<8x256xi1>
    %53 = vector.broadcast %cst_9 : f32 to vector<8x256xf32>
    %54 = arith.select %52, %48, %53 : vector<8x256xi1>, vector<8x256xf32>
    %55 = tpu.iota {dimensions = array<i32: 1>} : vector<8x256xi32>
    %56 = tpu.iota {dimensions = array<i32: 0>} : vector<8x256xi32>
    %cst_10 = arith.constant dense<0xFF800000> : vector<8xf32>
    %57 = vector.multi_reduction <maximumf>, %54, %cst_10 [1] : vector<8x256xf32> to vector<8xf32>
    %58 = vector.shape_cast %57 : vector<8xf32> to vector<8x1xf32>
    %59 = vector.broadcast %58 : vector<8x1xf32> to vector<8x256xf32>
    %60 = arith.cmpf oeq, %54, %59 : vector<8x256xf32>
    %c256_i32 = arith.constant 256 : i32
    %61 = vector.broadcast %c256_i32 : i32 to vector<8x256xi32>
    %62 = arith.select %60, %55, %61 : vector<8x256xi1>, vector<8x256xi32>
    %cst_11 = arith.constant dense<2147483647> : vector<8xi32>
    %63 = vector.multi_reduction <minsi>, %62, %cst_11 [1] : vector<8x256xi32> to vector<8xi32>
    %64 = vector.shape_cast %63 : vector<8xi32> to vector<8x1xi32>
    %cst_12 = arith.constant dense<0xFF800000> : vector<256xf32>
    %65 = vector.multi_reduction <maximumf>, %54, %cst_12 [0] : vector<8x256xf32> to vector<256xf32>
    %66 = vector.shape_cast %65 : vector<256xf32> to vector<1x256xf32>
    %67 = vector.broadcast %66 : vector<1x256xf32> to vector<8x256xf32>
    %68 = arith.cmpf oeq, %54, %67 : vector<8x256xf32>
    %c8_i32 = arith.constant 8 : i32
    %69 = vector.broadcast %c8_i32 : i32 to vector<8x256xi32>
    %70 = arith.select %68, %56, %69 : vector<8x256xi1>, vector<8x256xi32>
    %cst_13 = arith.constant dense<2147483647> : vector<256xi32>
    %71 = vector.multi_reduction <minsi>, %70, %cst_13 [0] : vector<8x256xi32> to vector<256xi32>
    %72 = vector.shape_cast %71 : vector<256xi32> to vector<1x256xi32>
    %73 = vector.broadcast %64 : vector<8x1xi32> to vector<8x256xi32>
    %74 = arith.cmpi eq, %73, %55 : vector<8x256xi32>
    %cst_14 = arith.constant 0.000000e+00 : f32
    %75 = vector.broadcast %cst_14 : f32 to vector<8x1xf32>
    %76 = arith.cmpf ogt, %9, %75 : vector<8x1xf32>
    %77 = vector.broadcast %76 : vector<8x1xi1> to vector<8x256xi1>
    %78 = arith.andi %74, %77 : vector<8x256xi1>
    %79 = arith.extui %78 : vector<8x256xi1> to vector<8x256xi32>
    %cst_15 = arith.constant dense<-2147483648> : vector<256xi32>
    %80 = vector.multi_reduction <maxsi>, %79, %cst_15 [0] : vector<8x256xi32> to vector<256xi32>
    %81 = vector.shape_cast %80 : vector<256xi32> to vector<1x256xi32>
    %c0_i32 = arith.constant 0 : i32
    %82 = vector.broadcast %c0_i32 : i32 to vector<1x256xi32>
    %83 = arith.cmpi sgt, %81, %82 : vector<1x256xi32>
    %c-1_i32 = arith.constant -1 : i32
    %84 = vector.broadcast %c-1_i32 : i32 to vector<8x256xi32>
    %85 = arith.select %78, %56, %84 : vector<8x256xi1>, vector<8x256xi32>
    %cst_16 = arith.constant dense<-2147483648> : vector<256xi32>
    %86 = vector.multi_reduction <maxsi>, %85, %cst_16 [0] : vector<8x256xi32> to vector<256xi32>
    %87 = vector.shape_cast %86 : vector<256xi32> to vector<1x256xi32>
    %88 = arith.select %83, %87, %72 : vector<1x256xi1>, vector<1x256xi32>
    %cst_17 = arith.constant 2.000000e+00 : f32
    %89 = vector.broadcast %cst_17 : f32 to vector<1x256xf32>
    %90 = arith.select %83, %89, %66 : vector<1x256xi1>, vector<1x256xf32>
    %91 = vector.broadcast %88 : vector<1x256xi32> to vector<8x256xi32>
    %92 = arith.cmpi eq, %56, %91 : vector<8x256xi32>
    %93 = arith.extui %92 : vector<8x256xi1> to vector<8x256xi32>
    %94 = arith.sitofp %93 : vector<8x256xi32> to vector<8x256xf32>
    %cst_18 = arith.constant dense<0.000000e+00> : vector<8x256xf32>
    %95 = tpu.matmul %3, %94, %cst_18 {dimension_numbers = #tpu.dot_dimension_numbers<[1], [0], [0], [1], [0, 0, 1, 1], [], []>} : vector<8x8xf32>, vector<8x256xf32>, vector<8x256xf32> -> vector<8x256xf32>
    %96 = vector.extract_strided_slice %95 {offsets = [0, 0], sizes = [1, 256], strides = [1, 1]} : vector<8x256xf32> to vector<1x256xf32>
    %97 = vector.extract_strided_slice %95 {offsets = [1, 0], sizes = [1, 256], strides = [1, 1]} : vector<8x256xf32> to vector<1x256xf32>
    %98 = vector.extract_strided_slice %95 {offsets = [2, 0], sizes = [1, 256], strides = [1, 1]} : vector<8x256xf32> to vector<1x256xf32>
    %99 = vector.extract_strided_slice %95 {offsets = [3, 0], sizes = [1, 256], strides = [1, 1]} : vector<8x256xf32> to vector<1x256xf32>
    %100 = vector.extract_strided_slice %95 {offsets = [4, 0], sizes = [1, 256], strides = [1, 1]} : vector<8x256xf32> to vector<1x256xf32>
    %cst_19 = arith.constant 5.000000e-01 : f32
    %101 = vector.broadcast %cst_19 : f32 to vector<1x256xf32>
    %102 = arith.cmpf olt, %90, %101 : vector<1x256xf32>
    %cst_20 = arith.constant 1.000000e+00 : f32
    %103 = vector.broadcast %cst_20 : f32 to vector<1x256xf32>
    %104 = arith.addf %100, %103 : vector<1x256xf32>
    %cst_21 = arith.constant 0.000000e+00 : f32
    %105 = vector.broadcast %cst_21 : f32 to vector<1x256xf32>
    %106 = arith.select %102, %105, %104 : vector<1x256xi1>, vector<1x256xf32>
    %107 = arith.fptosi %106 : vector<1x256xf32> to vector<1x256xi32>
    %c0_i32_22 = arith.constant 0 : i32
    %108 = vector.broadcast %c0_i32_22 : i32 to vector<1x256xi32>
    %109 = arith.cmpi sgt, %107, %108 : vector<1x256xi32>
    %110 = arith.addf %96, %98 : vector<1x256xf32>
    %cst_23 = arith.constant 5.000000e-01 : f32
    %111 = vector.broadcast %cst_23 : f32 to vector<1x256xf32>
    %112 = arith.mulf %111, %110 : vector<1x256xf32>
    %113 = arith.addf %97, %99 : vector<1x256xf32>
    %cst_24 = arith.constant 5.000000e-01 : f32
    %114 = vector.broadcast %cst_24 : f32 to vector<1x256xf32>
    %115 = arith.mulf %114, %113 : vector<1x256xf32>
    %116 = arith.subf %98, %96 : vector<1x256xf32>
    %cst_25 = arith.constant 1.000000e-10 : f32
    %117 = vector.broadcast %cst_25 : f32 to vector<1x256xf32>
    %118 = arith.maximumf %116, %117 : vector<1x256xf32>
    %119 = arith.subf %99, %97 : vector<1x256xf32>
    %cst_26 = arith.constant 1.000000e-10 : f32
    %120 = vector.broadcast %cst_26 : f32 to vector<1x256xf32>
    %121 = arith.maximumf %119, %120 : vector<1x256xf32>
    %122 = arith.subf %112, %10 : vector<1x256xf32>
    %123 = arith.mulf %122, %17 : vector<1x256xf32>
    %124 = arith.subf %115, %11 : vector<1x256xf32>
    %125 = arith.mulf %124, %18 : vector<1x256xf32>
    %126 = math.log %118 : vector<1x256xf32>
    %127 = arith.subf %126, %19 : vector<1x256xf32>
    %cst_27 = arith.constant 5.000000e+00 : f32
    %128 = vector.broadcast %cst_27 : f32 to vector<1x256xf32>
    %129 = arith.mulf %127, %128 : vector<1x256xf32>
    %130 = math.log %121 : vector<1x256xf32>
    %131 = arith.subf %130, %20 : vector<1x256xf32>
    %cst_28 = arith.constant 5.000000e+00 : f32
    %132 = vector.broadcast %cst_28 : f32 to vector<1x256xf32>
    %133 = arith.mulf %131, %132 : vector<1x256xf32>
    %134 = tpu.concatenate %123, %125, %129, %133 in 0 : vector<1x256xf32>, vector<1x256xf32>, vector<1x256xf32>, vector<1x256xf32> -> vector<4x256xf32>
    %c0_29 = arith.constant 0 : index
    %c0_30 = arith.constant 0 : index
    %c0_31 = arith.constant 0 : index
    %135 = vector.load %arg4[%c0_29, %c0_30, %c0_31] : memref<1x4x256xf32, #tpu.memory_space<vmem>>, vector<1x4x256xf32>
    %136 = vector.shape_cast %135 : vector<1x4x256xf32> to vector<4x256xf32>
    %137 = arith.subf %136, %134 : vector<4x256xf32>
    %138 = math.absf %137 : vector<4x256xf32>
    %cst_32 = arith.constant 1.000000e+00 : f32
    %139 = vector.broadcast %cst_32 : f32 to vector<4x256xf32>
    %140 = arith.cmpf olt, %138, %139 : vector<4x256xf32>
    %cst_33 = arith.constant 5.000000e-01 : f32
    %141 = vector.broadcast %cst_33 : f32 to vector<4x256xf32>
    %142 = arith.mulf %141, %137 : vector<4x256xf32>
    %143 = arith.mulf %142, %137 : vector<4x256xf32>
    %cst_34 = arith.constant 5.000000e-01 : f32
    %144 = vector.broadcast %cst_34 : f32 to vector<4x256xf32>
    %145 = arith.subf %138, %144 : vector<4x256xf32>
    %146 = arith.select %140, %143, %145 : vector<4x256xi1>, vector<4x256xf32>
    %cst_35 = arith.constant dense<0.000000e+00> : vector<256xf32>
    %147 = vector.multi_reduction <add>, %146, %cst_35 [0] : vector<4x256xf32> to vector<256xf32>
    %148 = vector.shape_cast %147 : vector<256xf32> to vector<1x256xf32>
    %cst_36 = arith.constant 0.000000e+00 : f32
    %149 = vector.broadcast %cst_36 : f32 to vector<1x256xf32>
    %150 = arith.select %109, %148, %149 : vector<1x256xi1>, vector<1x256xf32>
    %c0_37 = arith.constant 0 : index
    %c0_38 = arith.constant 0 : index
    %c0_39 = arith.constant 0 : index
    %151 = vector.load %arg5[%c0_37, %c0_38, %c0_39] : memref<1x21x256xf32, #tpu.memory_space<vmem>>, vector<1x21x256xf32>
    %152 = vector.shape_cast %151 : vector<1x21x256xf32> to vector<21x256xf32>
    %cst_40 = arith.constant dense<0xFF800000> : vector<256xf32>
    %153 = vector.multi_reduction <maximumf>, %152, %cst_40 [0] : vector<21x256xf32> to vector<256xf32>
    %154 = vector.shape_cast %153 : vector<256xf32> to vector<1x256xf32>
    %155 = vector.broadcast %154 : vector<1x256xf32> to vector<21x256xf32>
    %156 = arith.subf %152, %155 : vector<21x256xf32>
    %157 = math.exp %156 : vector<21x256xf32>
    %cst_41 = arith.constant dense<0.000000e+00> : vector<256xf32>
    %158 = vector.multi_reduction <add>, %157, %cst_41 [0] : vector<21x256xf32> to vector<256xf32>
    %159 = vector.shape_cast %158 : vector<256xf32> to vector<1x256xf32>
    %160 = math.log %159 : vector<1x256xf32>
    %161 = arith.addf %154, %160 : vector<1x256xf32>
    %162 = tpu.iota {dimensions = array<i32: 0>} : vector<21x256xi32>
    %163 = vector.broadcast %107 : vector<1x256xi32> to vector<21x256xi32>
    %164 = arith.cmpi eq, %162, %163 : vector<21x256xi32>
    %165 = arith.extui %164 : vector<21x256xi1> to vector<21x256xi32>
    %166 = arith.sitofp %165 : vector<21x256xi32> to vector<21x256xf32>
    %167 = arith.mulf %152, %166 : vector<21x256xf32>
    %cst_42 = arith.constant dense<0.000000e+00> : vector<256xf32>
    %168 = vector.multi_reduction <add>, %167, %cst_42 [0] : vector<21x256xf32> to vector<256xf32>
    %169 = vector.shape_cast %168 : vector<256xf32> to vector<1x256xf32>
    %170 = arith.subf %161, %169 : vector<1x256xf32>
    %171 = tpu.concatenate %150, %170, %106 in 0 : vector<1x256xf32>, vector<1x256xf32>, vector<1x256xf32> -> vector<3x256xf32>
    %c0_43 = arith.constant 0 : index
    %c0_44 = arith.constant 0 : index
    %c0_45 = arith.constant 0 : index
    %172 = vector.load %arg6[%c0_43, %c0_44, %c0_45] : memref<1x3x256xf32, #tpu.memory_space<vmem>>, vector<1x3x256xf32>
    %173 = vector.shape_cast %172 : vector<1x3x256xf32> to vector<3x256xf32>
    %174 = vector.shape_cast %171 : vector<3x256xf32> to vector<1x3x256xf32>
    tpu.vector_store %arg6[%c0_43, %c0_44, %c0_45], %174 {strides = array<i32>} : memref<1x3x256xf32, #tpu.memory_space<vmem>>, vector<1x3x256xf32>,
    return
  }
  func.func @transform_0(%arg0: i32) -> (i32, i32, i32) {
    %c0_i32 = arith.constant 0 : i32
    %c0_i32_0 = arith.constant 0 : i32
    %c0_i32_1 = arith.constant 0 : i32
    return %arg0, %c0_i32, %c0_i32_0 : i32, i32, i32
  }
  func.func @transform_1(%arg0: i32) -> (i32, i32, i32) {
    %c0_i32 = arith.constant 0 : i32
    %c0_i32_0 = arith.constant 0 : i32
    %c0_i32_1 = arith.constant 0 : i32
    return %arg0, %c0_i32, %c0_i32_0 : i32, i32, i32
  }
  func.func @transform_2(%arg0: i32) -> (i32, i32) {
    %c0_i32 = arith.constant 0 : i32
    %c0_i32_0 = arith.constant 0 : i32
    %c0_i32_1 = arith.constant 0 : i32
    return %c0_i32, %c0_i32_0 : i32, i32
  }
  func.func @transform_3(%arg0: i32) -> (i32, i32, i32) {
    %c0_i32 = arith.constant 0 : i32
    %c0_i32_0 = arith.constant 0 : i32
    %c0_i32_1 = arith.constant 0 : i32
    return %arg0, %c0_i32, %c0_i32_0 : i32, i32, i32
  }
  func.func @transform_4(%arg0: i32) -> (i32, i32, i32) {
    %c0_i32 = arith.constant 0 : i32
    %c0_i32_0 = arith.constant 0 : i32
    %c0_i32_1 = arith.constant 0 : i32
    return %arg0, %c0_i32, %c0_i32_0 : i32, i32, i32
  }
  func.func @transform_5(%arg0: i32) -> (i32, i32, i32) {
    %c0_i32 = arith.constant 0 : i32
    %c0_i32_0 = arith.constant 0 : i32
    %c0_i32_1 = arith.constant 0 : i32
    return %arg0, %c0_i32, %c0_i32_0 : i32, i32, i32
  }
}

</mosaic_0001>

<bundles_post_ra>
// kernel: tpu_custom_call.1
= control target key start
LH: loop header
LB: loop body
LE: loop exit
PB: predicated region body
PF: predicated region fallthrough
CT: control target
= control target key end

     0   :  { %s1028_s18 = smov 0   ;;  %s1234_s0 = inlined_call_operand.vmem [shape: f32[2,8,6], index: 0, kind: input, shape index: {}]   ;;  %s1235_s1 = inlined_call_operand.vmem [shape: f32[2,8,8], index: 1, kind: input, shape index: {}]   ;;  %s1236_s2 = inlined_call_operand.vmem [shape: f32[16,256], index: 2, kind: input, shape index: {}]   ;;  %s1237_s3 = inlined_call_operand.vmem [shape: f32[2,4,256], index: 3, kind: input, shape index: {}]   ;;  %s1238_s4 = inlined_call_operand.vmem [shape: f32[2,21,256], index: 4, kind: input, shape index: {}]   ;;  %s1239_s5 = inlined_call_operand.vmem [shape: f32[2,3,256], index: 5, kind: output, shape index: {}]  }
   0x1 LB: > { %s901_s19 = sadd.s32 4294967295, %s987_s18   ;;  %p905_p0 = scmp.ge.s32.totalorder %s987_s18, 1  ;;  %s987_s18 = sphi %s1028_s18, %s15_s18  }
   0x2   : > { %p215_p1 = scmp.lt.s32.totalorder %s987_s18, 3 }
   0x4   : > { %p216_p2 = pnand %p905_p0, %p215_p1 }
   0x5   : > { %p256_p3 = scmp.lt.s32.totalorder (!%p216_p2), %s901_s19, 1  ;;  %v989_v0 = vmov (!%p216_p2), 0   ;;  %v990_v1 = vmov (!%p216_p2), 2   ;;  %s991_s24 = smov (!%p216_p2), 2   ;;  %v992_v3 = vmov (!%p216_p2), 1   ;;  %v993_v4 = vmov (!%p216_p2), 3  }
   0x6   : > { %219 = sbr.rel (%p216_p2) target bundleno = 1132 (0x46c), region = 40  ;;  %951 = vset.pattern.permute.xlu1 (!%p216_p2), %v989_v0  ;;  %953 = vset.pattern.permute.xlu0 (!%p216_p2), %v990_v1  ;;  %s994_s25 = smov (!%p216_p2), 127   ;;  %v995_v8 = vmov (!%p216_p2), 5   ;;  %v290_v11 = vlaneseq (!%p216_p2)  ;;  %v1056_v17 = vld [vmem:[%s1236_s2] sm:$0xff] (!%p216_p2)  ;;  %v1061_v18 = vld [vmem:[%s1236_s2 + $0x8] sm:$0xff] (!%p216_p2)  ;;  %v1079_v44 = vld [vmem:[%s1236_s2 + $0x10] sm:$0xff] (!%p216_p2) }
   0x7   : > { %v1084_v45 = vld [vmem:[%s1236_s2 + $0x18] sm:$0xff] (!%p216_p2) }
   0x8   : > { %v1047_v13 = vshrl.u32 (!%p216_p2), %v290_v11, 7 }
   0xa   : > { %v1050_v14 = vsub.s32 (!%p216_p2), 4, %v1047_v13  ;;  %v306_v15 = vsub.s32 (!%p216_p2), 5, %v1047_v13  ;;  %v334_v19 = vsub.s32 (!%p216_p2), 7, %v1047_v13  ;;  %v320_v20 = vsub.s32 (!%p216_p2), 6, %v1047_v13 }
   0xb   : > { %v368_v39 = vsub.s32 (!%p216_p2), 0, %v1047_v13 }
   0xc   : > { %v293_v21 = vrot.slane (!%p216_p2), %v1056_v17, %v1050_v14  ;;  %v297_v22 = vrot.slane (!%p216_p2), %v1061_v18, %v1050_v14  ;;  %v307_v23 = vrot.slane (!%p216_p2), %v1056_v17, %v306_v15  ;;  %v311_v24 = vrot.slane (!%p216_p2), %v1061_v18, %v306_v15 }
   0xd   : > { %s1241_s19 = smov (!%p256_p3, %s901_s19), 1  ;;  %v335_v25 = vrot.slane %v1056_v17, %v334_v19  ;;  %v339_v26 = vrot.slane %v1061_v18, %v334_v19  ;;  %v321_v27 = vrot.slane %v1056_v17, %v320_v20  ;;  %v325_v28 = vrot.slane %v1061_v18, %v320_v20 }
   0xe   : > { %s1040_s20 = sshll.u32 %s1241_s19, 3  ;;  %v369_v46 = vrot.slane %v1079_v44, %v368_v39  ;;  %v373_v47 = vrot.slane %v1084_v45, %v368_v39  ;;  %s929_s12 = smul.u32 48, %s1241_s19 }
   0xf   : > { %s259_s23 = scalar_lea.vmem %s1234_s0, %s1040_s20  ;;  %s263_s11 = scalar_lea.vmem %s1235_s1, %s1040_s20 }
  0x10   : > { %v279_v2 = vld [vmem:[%s259_s23] sm:$0xff]  ;;  %s273_s15 = scalar_lea.vmem %s1238_s4, %s929_s12  ;;  %s268_s19 = scalar_lea.vmem %s1237_s3, %s1040_s20 }
  0x11   : > { %352 = vrot.lane.b32.xlu0 %v279_v2, %s991_s24  ;;  %287 = vperm.xlu1 %951, %v279_v2   ;;  %vm382_vm0 = vcmp.gt.f32.partialorder %v279_v2, 0.0  ;;  %s278_s23 = scalar_lea.vmem %s1239_s5, %s1040_s20 }
  0x12   : > { %v383_v7 = vsel %vm382_vm0, 1, %v989_v0 }
  0x15   : > { %952 = vset.pattern.permute.xlu1 %v992_v3 }
  0x16   : > { %301 = vperm.xlu1 %952, %v279_v2  }
  0x1a   : > { %954 = vset.pattern.permute.xlu1 %v993_v4  ;;  %v391_v4 = vand.u32 127, %v290_v11 }
  0x1b   : > { %329 = vperm.xlu1 %954, %v279_v2  }
  0x1f   : > { %955 = vset.pattern.permute.xlu1 %v990_v1 }
  0x83   : > { %v353_v5 = vpop.permute.xlu0 %352 }
  0x84   : > { %v355_v6 = vsub.f32 %v279_v2, %v353_v5  ;;  %v392_v5 = vadd.s32 128, %v391_v4 }
  0x86   : > { %357 = vrot.lane.b32.xlu0 %v355_v6, %s994_s25 }
  0x8a   : > { %315 = vperm.xlu0 %953, %v279_v2  }
  0x8e   : > { %956 = vset.pattern.permute.xlu0 %v995_v8 }
  0x8f   : > { %385 = vperm.xlu0 %956, %v383_v7  }
  0x90   : > { %v288_v12 = vpop.permute.xlu1 %287 }
  0x91   : > { %v298_v31 = vmax.f32 %v288_v12, %v293_v21  ;;  %v299_v32 = vmax.f32 %v288_v12, %v297_v22  ;;  %v996_v21 = vmov 0.0  }
  0x92   : > { %576 = vmatprep.mubr.f32.mxu0 %v996_v21 }
  0x95   : > { %v302_v16 = vpop.permute.xlu1 %301 }
  0x96   : > { %v312_v33 = vmax.f32 %v302_v16, %v307_v23  ;;  %v313_v34 = vmax.f32 %v302_v16, %v311_v24 }
  0x9a   : > { %v330_v29 = vpop.permute.xlu1 %329 }
  0x9b   : > { %v340_v35 = vmin.f32 %v330_v29, %v335_v25  ;;  %v341_v36 = vmin.f32 %v330_v29, %v339_v26 }
  0x9d   : > { %v346_v40 = vsub.f32 %v340_v35, %v312_v33  ;;  %v347_v41 = vsub.f32 %v341_v36, %v313_v34 }
  0x9f   : > { %v348_v48 = vmax.f32 %v346_v40, 0.0  ;;  %v349_v49 = vmax.f32 %v347_v41, 0.0 }
  0xf8   : > { %v358_v9 = vpop.permute.xlu0 %357 }
  0xf9   : > { %v360_v10 = vmul.f32 %v358_v9, %v355_v6 }
  0xfb   : > { %363 = vperm.xlu1 %955, %v360_v10  }
 0x109   : > { %v316_v30 = vpop.permute.xlu0 %315 }
 0x10a   : > { %v326_v37 = vmin.f32 %v316_v30, %v321_v27  ;;  %v327_v38 = vmin.f32 %v316_v30, %v325_v28 }
 0x10c   : > { %v342_v42 = vsub.f32 %v326_v37, %v298_v31  ;;  %v343_v43 = vsub.f32 %v327_v38, %v299_v32 }
 0x10e   : > { %v344_v50 = vmax.f32 %v342_v42, 0.0  ;;  %v345_v51 = vmax.f32 %v343_v43, 0.0  ;;  %v386_v59 = vpop.permute.xlu0 %385 }
 0x10f   : > { %vm387_vm1 = vcmp.eq.s32.totalorder %v386_v59, 1 }
 0x110   : > { %v350_v53 = vmul.f32 %v348_v48, %v344_v50  ;;  %v351_v54 = vmul.f32 %v349_v49, %v345_v51 }
 0x17a   : > { %v364_v52 = vpop.permute.xlu1 %363 }
 0x17b   : > { %v374_v55 = vadd.f32 %v369_v46, %v364_v52  ;;  %v375_v56 = vadd.f32 %v373_v47, %v364_v52 }
 0x17d   : > { %v376_v57 = vsub.f32 %v374_v55, %v350_v53  ;;  %v377_v58 = vsub.f32 %v375_v56, %v351_v54 }
 0x17f   : > { %957 = vrcp.f32 %v376_v57 }
 0x180   : > { %959 = vrcp.f32 %v377_v58 }
 0x189   : > { %v958_v60 = vpop.eup %957 }
 0x18a   : > { %v960_v61 = vpop.eup %959  ;;  %v380_v62 = vmul.f32 %v958_v60, %v350_v53 }
 0x18b   : > { %v381_v63 = vmul.f32 %v960_v61, %v351_v54 }
 0x18c   : > { %v388_v1 = vsel %vm387_vm1, %v380_v62, -1.0 }
 0x18d   : > { %v389_v2 = vsel %vm387_vm1, %v381_v63, -1.0  ;;  %v418_v11 = vrot.slane %v388_v1, 4 }
 0x18e   : > { %v395_v3 = vmax.f32 %v388_v1, %v389_v2  ;;  %v424_v22 = vrot.slane %v389_v2, 4 }
 0x18f   : > { %v419_v23 = vmax.f32 %v388_v1, %v418_v11 }
 0x190   : > { %396 = vmax.xlane.f32.xlu1 %v395_v3  ;;  %v425_v24 = vmax.f32 %v389_v2, %v424_v22 }
 0x191   : > { %v420_v26 = vrot.slane %v419_v23, 2 }
 0x192   : > { %v426_v25 = vrot.slane %v425_v24, 2 }
 0x193   : > { %v421_v28 = vmax.f32 %v419_v23, %v420_v26  ;;  %v997_v26 = vmov 1.0  }
 0x194   : > { %v427_v27 = vmax.f32 %v425_v24, %v426_v25  ;;  %v280_v25 = vld [vmem:[%s263_s11] sm:$0xff] }
 0x195   : > { %v422_v30 = vrot.slane %v421_v28, 1 }
 0x196   : > { %v428_v29 = vrot.slane %v427_v27, 1 }
 0x197   : > { %v1093_v32 = vmax.f32 %v421_v28, %v422_v30  ;;  %v1127_v28 = vld [vmem:[%s273_s15 + $0x28] sm:$0x1f] }
 0x198   : > { %v1091_v31 = vmax.f32 %v427_v27, %v428_v29  ;;  %v1125_v27 = vld [vmem:[%s273_s15 + $0x20] sm:$0x1f] }
 0x199   : > { %vm430_vm7 = vcmp.eq.f32.partialorder %v388_v1, %v1093_v32  ;;  %v1129_v29 = vld [vmem:[%s273_s15] sm:$0xff] }
 0x19a   : > { %vm431_vm6 = vcmp.eq.f32.partialorder %v389_v2, %v1091_v31  ;;  %v432_v34 = vsel %vm430_vm7, %v1047_v13, 8 }
 0x19b   : > { %v433_v33 = vsel %vm431_vm6, %v1047_v13, 8  ;;  %v434_v36 = vrot.slane %v432_v34, 4 }
 0x19c   : > { %v443_v35 = vrot.slane %v433_v33, 4 }
 0x19d   : > { %vm435_vm9 = vcmp.lt.s32.totalorder %v432_v34, %v434_v36 }
 0x19e   : > { %vm444_vm8 = vcmp.lt.s32.totalorder %v433_v33, %v443_v35  ;;  %v436_v40 = vsel %vm435_vm9, %v432_v34, %v434_v36  ;;  %v1138_v36 = vld [vmem:[%s273_s15 + $0x10] sm:$0xff] }
 0x19f   : > { %v445_v39 = vsel %vm444_vm8, %v433_v33, %v443_v35  ;;  %v437_v47 = vrot.slane %v436_v40, 2  ;;  %v1133_v33 = vld [vmem:[%s273_s15 + $0x8] sm:$0xff] }
 0x1a0   : > { %v446_v46 = vrot.slane %v445_v39, 2 }
 0x1a1   : > { %vm438_vm15 = vcmp.lt.s32.totalorder %v436_v40, %v437_v47 }
 0x1a2   : > { %vm447_vm14 = vcmp.lt.s32.totalorder %v445_v39, %v446_v46  ;;  %v439_v57 = vsel %vm438_vm15, %v436_v40, %v437_v47 }
 0x1a3   : > { %v448_v56 = vsel %vm447_vm14, %v445_v39, %v446_v46 }
 0x1a4   : > { %v449_v3 = vrot.slane %v448_v56, 1 }
 0x1a6   : > { %vm450_vm9 = vcmp.lt.s32.totalorder %v448_v56, %v449_v3 }
 0x1a7   : > { %v451_v22 = vsel %vm450_vm9, %v448_v56, %v449_v3 }
 0x21d   : > { %v397_v6 = vpop.xlane.xlu1 %396 }
 0x21e   : > { %vm398_vm2 = vcmp.eq.f32.partialorder %v388_v1, %v397_v6  ;;  %vm399_vm3 = vcmp.eq.f32.partialorder %v389_v2, %v397_v6  ;;  %v440_v2 = vrot.slane %v439_v57, 1 }
 0x21f   : > { %v400_v7 = vsel %vm398_vm2, %v391_v4, 256  ;;  %v401_v8 = vsel %vm399_vm3, %v392_v5, 256 }
 0x220   : > { %vm402_vm4 = vcmp.lt.s32.totalorder %v400_v7, %v401_v8  ;;  %vm441_vm8 = vcmp.lt.s32.totalorder %v439_v57, %v440_v2 }
 0x221   : > { %v403_v9 = vsel %vm402_vm4, %v400_v7, %v401_v8  ;;  %v442_v11 = vsel %vm441_vm8, %v439_v57, %v440_v2 }
 0x222   : > { %v405_v10 = vshra.s32 %v403_v9, 16  ;;  %v404_v15 = vand.u32 65535, %v403_v9 }
 0x224   : > { %v407_v12 = vcvt.s32.f32 %v405_v10  ;;  %v406_v19 = vcvt.s32.f32 %v404_v15 }
 0x226   : > { %408 = vmin.xlane.f32.xlu0 %v407_v12 }
 0x2b3   : > { %v409_v16 = vpop.xlane.xlu0 %408 }
 0x2b4   : > { %vm410_vm5 = vcmp.eq.f32.partialorder %v407_v12, %v409_v16  ;;  %v415_v37 = vcvt.f32.s32 %v409_v16 }
 0x2b5   : > { %v411_v20 = vsel %vm410_vm5, %v406_v19, inf }
 0x2b6   : > { %412 = vmin.xlane.f32.xlu1 %v411_v20  ;;  %v416_v41 = vshll.u32 %v415_v37, 16 }
 0x343   : > { %v413_v38 = vpop.xlane.xlu1 %412 }
 0x344   : > { %v414_v42 = vcvt.f32.s32 %v413_v38  ;;  %v1141_v38 = vld [vmem:[%s273_s15 + $0x18] sm:$0xff] }
 0x346   : > { %v417_v43 = vadd.s32 %v416_v41, %v414_v42 }
 0x348   : > { %vm452_vm10 = vcmp.eq.s32.totalorder %v417_v43, %v391_v4  ;;  %vm453_vm11 = vcmp.eq.s32.totalorder %v417_v43, %v392_v5 }
 0x349   : > { %vm454_vm12 = vmand %vm452_vm10, %vm387_vm1 }
 0x34a   : > { %vm455_vm13 = vmand %vm453_vm11, %vm387_vm1  ;;  %v456_v48 = vsel %vm454_vm12, 1, %v989_v0  ;;  %v478_v49 = vsel %vm454_vm12, %v1047_v13, 4294967295 }
 0x34b   : > { %v457_v50 = vsel %vm455_vm13, 1, %v989_v0  ;;  %v458_v51 = vrot.slane %v456_v48, 4  ;;  %v479_v52 = vsel %vm455_vm13, %v1047_v13, 4294967295  ;;  %v480_v53 = vrot.slane %v478_v49, 4 }
 0x34c   : > { %v467_v54 = vrot.slane %v457_v50, 4  ;;  %v489_v55 = vrot.slane %v479_v52, 4 }
 0x34d   : > { %vm459_vm0 = vcmp.gt.s32.totalorder %v456_v48, %v458_v51  ;;  %vm481_vm2 = vcmp.gt.s32.totalorder %v478_v49, %v480_v53 }
 0x34e   : > { %v460_v58 = vsel %vm459_vm0, %v456_v48, %v458_v51  ;;  %vm468_vm1 = vcmp.gt.s32.totalorder %v457_v50, %v467_v54  ;;  %v482_v59 = vsel %vm481_vm2, %v478_v49, %v480_v53  ;;  %vm490_vm3 = vcmp.gt.s32.totalorder %v479_v52, %v489_v55 }
 0x34f   : > { %v461_v60 = vrot.slane %v460_v58, 2  ;;  %v469_v61 = vsel %vm468_vm1, %v457_v50, %v467_v54  ;;  %v483_v62 = vrot.slane %v482_v59, 2  ;;  %v491_v63 = vsel %vm490_vm3, %v479_v52, %v489_v55 }
 0x350   : > { %v470_v1 = vrot.slane %v469_v61, 2  ;;  %v492_v0 = vrot.slane %v491_v63, 2  ;;  %vm508_vm1 = vcmask 64512   ;;  %vm674_vm3 = vcmask 1044480  }
 0x351   : > { %vm462_vm4 = vcmp.gt.s32.totalorder %v460_v58, %v461_v60  ;;  %vm484_vm5 = vcmp.gt.s32.totalorder %v482_v59, %v483_v62  ;;  %v675_v30 = vsel %vm674_vm3, %v1125_v27, -inf  ;;  %v684_v34 = vsel %vm674_vm3, %v1127_v28, -inf }
 0x352   : > { %vm471_vm6 = vcmp.gt.s32.totalorder %v469_v61, %v470_v1  ;;  %vm493_vm7 = vcmp.gt.s32.totalorder %v491_v63, %v492_v0  ;;  %v463_v4 = vsel %vm462_vm4, %v460_v58, %v461_v60  ;;  %v485_v5 = vsel %vm484_vm5, %v482_v59, %v483_v62 }
 0x353   : > { %v472_v6 = vsel %vm471_vm6, %v469_v61, %v470_v1  ;;  %v494_v7 = vsel %vm493_vm7, %v491_v63, %v492_v0  ;;  %v464_v8 = vrot.slane %v463_v4, 1  ;;  %v486_v9 = vrot.slane %v485_v5, 1 }
 0x354   : > { %v473_v10 = vrot.slane %v472_v6, 1  ;;  %v495_v12 = vrot.slane %v494_v7, 1  ;;  %v676_v35 = vmax.f32 %v1129_v29, %v675_v30  ;;  %v685_v37 = vmax.f32 %v1133_v33, %v684_v34 }
 0x355   : > { %vm465_vm10 = vcmp.gt.s32.totalorder %v463_v4, %v464_v8  ;;  %vm487_vm11 = vcmp.gt.s32.totalorder %v485_v5, %v486_v9 }
 0x356   : > { %vm474_vm12 = vcmp.gt.s32.totalorder %v472_v6, %v473_v10  ;;  %vm496_vm13 = vcmp.gt.s32.totalorder %v494_v7, %v495_v12  ;;  %v1105_v15 = vsel %vm465_vm10, %v463_v4, %v464_v8  ;;  %v488_v16 = vsel %vm487_vm11, %v485_v5, %v486_v9 }
 0x357   : > { %v1107_v19 = vsel %vm474_vm12, %v472_v6, %v473_v10  ;;  %v497_v20 = vsel %vm496_vm13, %v494_v7, %v495_v12  ;;  %vm476_vm14 = vcmp.gt.s32.totalorder %v1105_v15, 0  ;;  %v677_v39 = vmax.f32 %v676_v35, %v1138_v36 }
 0x358   : > { %vm477_vm15 = vcmp.gt.s32.totalorder %v1107_v19, 0  ;;  %v498_v23 = vsel %vm476_vm14, %v488_v16, %v442_v11  ;;  %v686_v40 = vmax.f32 %v685_v37, %v1141_v38  ;;  %v500_v37 = vsel %vm476_vm14, 2.0, %v1093_v32 }
 0x359   : > { %v499_v24 = vsel %vm477_vm15, %v497_v20, %v451_v22  ;;  %vm502_vm0 = vcmp.eq.s32.totalorder %v1047_v13, %v498_v23  ;;  %v678_v41 = vrot.slane %v677_v39, 4  ;;  %vm583_vm4 = vcmp.lt.f32.partialorder %v500_v37, 0.5 }
 0x35a   : > { %vm503_vm2 = vcmp.eq.s32.totalorder %v1047_v13, %v499_v24  ;;  %v687_v42 = vrot.slane %v686_v40, 4  ;;  %vm630_vm12 = vcmask 1041408   ;;  %vm633_vm13 = vcmask 1042432  }
 0x35b   : > { %915 = vmatprep.subr.msk.mxu0 %vm503_vm2, %v997_v26  ;;  %v679_v43 = vmax.f32 %v677_v39, %v678_v41  ;;  %v501_v39 = vsel %vm477_vm15, 2.0, %v1091_v31  ;;  %v615_v41 = vrot.slane %v1079_v44, 1  ;;  %vm651_vm15 = vcmask 1043456  }
 0x35c   : > { %916 = vmatpush1.msk.msra.mxu0 %vm502_vm0, %v997_v26  ;;  %v688_v46 = vmax.f32 %v686_v40, %v687_v42  ;;  %v616_v42 = vrot.slane %v1084_v45, 1  ;;  %vm584_vm5 = vcmp.lt.f32.partialorder %v501_v39, 0.5  ;;  %v636_v45 = vld [vmem:[%s268_s19] sm:$0xff]  ;;  %vm629_vm2 = vcmask 1040384  }
 0x35d   : > { %917 = vmatmul.mubr.msk.f32.vlgmr.msra.gmra.mrb[0].mxu0 %vm508_vm1, %v280_v25  ;;  %v680_v47 = vrot.slane %v679_v43, 2 }
 0x35e   : > { %v689_v48 = vrot.slane %v688_v46, 2 }
 0x35f   : > { %v681_v49 = vmax.f32 %v679_v43, %v680_v47 }
 0x360   : > { %v690_v50 = vmax.f32 %v688_v46, %v689_v48 }
 0x361   : > { %v682_v51 = vrot.slane %v681_v49, 1 }
 0x362   : > { %v691_v52 = vrot.slane %v690_v50, 1 }
 0x363   : > { %v1145_v53 = vmax.f32 %v681_v49, %v682_v51 }
 0x364   : > { %v1147_v54 = vmax.f32 %v690_v50, %v691_v52 }
 0x365   : > { %v693_v55 = vsub.f32 %v1129_v29, %v1145_v53  ;;  %v695_v57 = vsub.f32 %v1138_v36, %v1145_v53  ;;  %v697_v58 = vsub.f32 %v1125_v27, %v1145_v53 }
 0x366   : > { %v694_v56 = vsub.f32 %v1133_v33, %v1147_v54  ;;  %v696_v59 = vsub.f32 %v1141_v38, %v1147_v54  ;;  %v698_v61 = vsub.f32 %v1127_v28, %v1147_v54 }
 0x367   : > { %v699_v60 = vmul.f32 1.442695, %v693_v55  ;;  %v703_v63 = vmul.f32 1.442695, %v695_v57  ;;  %v707_v1 = vmul.f32 1.442695, %v697_v58 }
 0x368   : > { %v701_v62 = vmul.f32 1.442695, %v694_v56  ;;  %v705_v0 = vmul.f32 1.442695, %v696_v59  ;;  %v709_v2 = vmul.f32 1.442695, %v698_v61 }
 0x369   : > { %961 = vpow2.f32 %v699_v60  ;;  %v735_v56 = vadd.s32 8, %v1047_v13 }
 0x36a   : > { %963 = vpow2.f32 %v701_v62 }
 0x36b   : > { %965 = vpow2.f32 %v703_v63 }
 0x36c   : > { %967 = vpow2.f32 %v707_v1 }
 0x36d   : > { %969 = vpow2.f32 %v705_v0 }
 0x36e   : > { %971 = vpow2.f32 %v709_v2 }
 0x373   : > { %v962_v3 = vpop.eup %961 }
 0x374   : > { %v964_v4 = vpop.eup %963 }
 0x375   : > { %v966_v5 = vpop.eup %965 }
 0x376   : > { %v968_v6 = vpop.eup %967  ;;  %v711_v9 = vadd.f32 %v966_v5, %v962_v3  ;;  %v736_v3 = vadd.s32 16, %v1047_v13 }
 0x377   : > { %v970_v7 = vpop.eup %969  ;;  %v712_v10 = vsel %vm674_vm3, %v968_v6, 0.0 }
 0x378   : > { %v972_v8 = vpop.eup %971  ;;  %v720_v12 = vadd.f32 %v970_v7, %v964_v4  ;;  %v713_v20 = vadd.f32 %v712_v10, %v711_v9 }
 0x379   : > { %v721_v16 = vsel %vm674_vm3, %v972_v8, 0.0 }
 0x37a   : > { %v722_v11 = vadd.f32 %v721_v16, %v720_v12  ;;  %v714_v22 = vrot.slane %v713_v20, 4 }
 0x37c   : > { %v723_v23 = vrot.slane %v722_v11, 4  ;;  %v715_v24 = vadd.f32 %v714_v22, %v713_v20 }
 0x37e   : > { %v724_v25 = vadd.f32 %v723_v23, %v722_v11  ;;  %v716_v26 = vrot.slane %v715_v24, 2 }
 0x380   : > { %v725_v30 = vrot.slane %v724_v25, 2  ;;  %v717_v34 = vadd.f32 %v716_v26, %v715_v24 }
 0x382   : > { %v726_v35 = vadd.f32 %v725_v30, %v724_v25  ;;  %v718_v40 = vrot.slane %v717_v34, 1 }
 0x384   : > { %v727_v46 = vrot.slane %v726_v35, 1  ;;  %v719_v52 = vadd.f32 %v718_v40, %v717_v34 }
 0x386   : > { %v728_v60 = vadd.f32 %v727_v46, %v726_v35  ;;  %973 = vlog2.f32 %v719_v52 }
 0x390   : > { %v974_v30 = vpop.eup %973 }
 0x430   : > { %v578_v43 = vpop.f32.mrb[0].mxu0 }
 0x431   : > { %v585_v47 = vadd.f32 1.0, %v578_v43  ;;  %v595_v48 = vrot.slane %v578_v43, 2  ;;  %v603_v49 = vrot.slane %v578_v43, 6  ;;  %v580_v50 = vpop.f32.mrb[1].mxu0 }
 0x432   : > { %v586_v51 = vadd.f32 1.0, %v580_v50  ;;  %v596_v15 = vrot.slane %v580_v50, 2  ;;  %v604_v32 = vrot.slane %v580_v50, 6 }
 0x433   : > { %v1171_v55 = vsel %vm583_vm4, 0.0, %v585_v47  ;;  %v599_v31 = vadd.f32 %v595_v48, %v578_v43  ;;  %v607_v19 = vsub.f32 %v578_v43, %v603_v49 }
 0x434   : > { %v930_v57 = vtrunc.f32 %v1171_v55  ;;  %v1175_v58 = vsel %vm584_vm5, 0.0, %v586_v51  ;;  %v600_v59 = vadd.f32 %v596_v15, %v580_v50  ;;  %v608_v1 = vsub.f32 %v580_v50, %v604_v32 }
 0x435   : > { %v601_v61 = vmul.f32 0.5, %v599_v31  ;;  %v609_v62 = vmax.f32 %v607_v19, 1e-10  ;;  %v932_v63 = vtrunc.f32 %v1175_v58  ;;  %v730_v51 = vmul.f32 0.6931472, %v974_v30 }
 0x436   : > { %v1178_v0 = vcvt.f32.s32 %v930_v57  ;;  %v602_v2 = vmul.f32 0.5, %v600_v59  ;;  %v610_v6 = vmax.f32 %v608_v1, 1e-10 }
 0x437   : > { %v611_v4 = vsub.f32 %v601_v61, %v1056_v17  ;;  %975 = vlog2.f32 %v609_v62  ;;  %v1182_v5 = vcvt.f32.s32 %v932_v63  ;;  %v733_v59 = vadd.f32 %v730_v51, %v1145_v53 }
 0x438   : > { %v740_v7 = vrot.slane %v1178_v0, %v1050_v14  ;;  %v612_v8 = vsub.f32 %v602_v2, %v1061_v18  ;;  %977 = vlog2.f32 %v728_v60  ;;  %vm591_vm0 = vcmp.gt.s32.totalorder %v1178_v0, 0 }
 0x439   : > { %v619_v9 = vmul.f32 %v615_v41, %v611_v4  ;;  %979 = vlog2.f32 %v610_v6  ;;  %v744_v10 = vrot.slane %v1182_v5, %v1050_v14  ;;  %vm592_vm1 = vcmp.gt.s32.totalorder %v1182_v5, 0 }
 0x43a   : > { %vm745_vm6 = vcmp.eq.s32.totalorder %v1047_v13, %v740_v7  ;;  %v620_v17 = vmul.f32 %v616_v42, %v612_v8  ;;  %vm747_vm7 = vcmp.eq.s32.totalorder %v735_v56, %v740_v7  ;;  %vm749_vm8 = vcmp.eq.s32.totalorder %v736_v3, %v740_v7 }
 0x43b   : > { %v919_v12 = vsel %vm745_vm6, 1.0, %v996_v21  ;;  %vm746_vm9 = vcmp.eq.s32.totalorder %v1047_v13, %v744_v10  ;;  %vm748_vm10 = vcmp.eq.s32.totalorder %v735_v56, %v744_v10  ;;  %vm750_vm11 = vcmp.eq.s32.totalorder %v736_v3, %v744_v10 }
 0x43c   : > { %v763_v18 = vmul.f32 %v919_v12, %v1129_v29  ;;  %v920_v16 = vsel %vm746_vm9, 1.0, %v996_v21  ;;  %v921_v20 = vsel %vm747_vm7, 1.0, %v996_v21  ;;  %v922_v14 = vsel %vm748_vm10, 1.0, %v996_v21 }
 0x43d   : > { %v923_v11 = vsel %vm749_vm8, 1.0, %v996_v21  ;;  %v924_v22 = vsel %vm750_vm11, 1.0, %v996_v21  ;;  %v764_v23 = vmul.f32 %v920_v16, %v1133_v33  ;;  %v765_v24 = vmul.f32 %v921_v20, %v1138_v36 }
 0x43e   : > { %v766_v13 = vmul.f32 %v922_v14, %v1141_v38  ;;  %v767_v25 = vmul.f32 %v923_v11, %v1125_v27  ;;  %v768_v29 = vmul.f32 %v924_v22, %v1127_v28 }
 0x43f   : > { %v769_v26 = vadd.f32 %v765_v24, %v763_v18 }
 0x440   : > { %v770_v34 = vsel %vm674_vm3, %v767_v25, 0.0  ;;  %v778_v35 = vadd.f32 %v766_v13, %v764_v23  ;;  %v779_v37 = vsel %vm674_vm3, %v768_v29, 0.0 }
 0x441   : > { %v976_v39 = vpop.eup %975  ;;  %v771_v40 = vadd.f32 %v770_v34, %v769_v26 }
 0x442   : > { %v978_v21 = vpop.eup %977  ;;  %v622_v33 = vmul.f32 0.6931472, %v976_v39  ;;  %v780_v43 = vadd.f32 %v779_v37, %v778_v35  ;;  %v797_v35 = vrot.slane %v1171_v55, 2 }
 0x443   : > { %v980_v36 = vpop.eup %979  ;;  %v772_v46 = vrot.slane %v771_v40, 4 }
 0x444   : > { %v625_v27 = vsub.f32 %v622_v33, %v615_v41  ;;  %v624_v38 = vmul.f32 0.6931472, %v980_v36  ;;  %v781_v28 = vrot.slane %v780_v43, 4  ;;  %v732_v41 = vmul.f32 0.6931472, %v978_v21 }
 0x445   : > { %v773_v47 = vadd.f32 %v772_v46, %v771_v40  ;;  %v798_v21 = vrot.slane %v1175_v58, 2 }
 0x446   : > { %v627_v48 = vmul.f32 5.0, %v625_v27  ;;  %v626_v49 = vsub.f32 %v624_v38, %v616_v42  ;;  %v782_v50 = vadd.f32 %v781_v28, %v780_v43  ;;  %v734_v62 = vadd.f32 %v732_v41, %v1147_v54 }
 0x447   : > { %v774_v15 = vrot.slane %v773_v47, 2 }
 0x448   : > { %v628_v32 = vmul.f32 5.0, %v626_v49  ;;  %v631_v44 = vsel %vm630_vm12, %v619_v9, %v627_v48  ;;  %v783_v52 = vrot.slane %v782_v50, 2 }
 0x449   : > { %v634_v31 = vsel %vm633_vm13, %v631_v44, %v627_v48  ;;  %v775_v19 = vadd.f32 %v774_v15, %v773_v47 }
 0x44a   : > { %v632_v56 = vsel %vm630_vm12, %v620_v17, %v628_v32  ;;  %v784_v57 = vadd.f32 %v783_v52, %v782_v50 }
 0x44b   : > { %v635_v42 = vsel %vm633_vm13, %v632_v56, %v628_v32  ;;  %v776_v60 = vrot.slane %v775_v19, 1 }
 0x44c   : > { %v639_v61 = vcombine.low %v634_v31, %v635_v42  ;;  %v785_v63 = vrot.slane %v784_v57, 1 }
 0x44d   : > { %v777_v1 = vadd.f32 %v776_v60, %v775_v19 }
 0x44e   : > { %v641_v2 = vsub.f32 %v636_v45, %v639_v61  ;;  %v786_v3 = vadd.f32 %v785_v63, %v784_v57 }
 0x44f   : > { %v787_v4 = vsub.f32 %v733_v59, %v777_v1 }
 0x450   : > { %v642_v6 = vand.u32 2147483647, %v641_v2  ;;  %v644_v7 = vmul.f32 0.5, %v641_v2  ;;  %v788_v8 = vsub.f32 %v734_v62, %v786_v3 }
 0x452   : > { %vm643_vm14 = vcmp.lt.f32.partialorder %v642_v6, 1.0  ;;  %v645_v9 = vmul.f32 %v644_v7, %v641_v2  ;;  %v918_v10 = vadd.f32 -0.5, %v642_v6 }
 0x454   : > { %v647_v17 = vsel %vm643_vm14, %v645_v9, %v918_v10 }
 0x455   : > { %v649_v12 = vcombine.high %v647_v17, %v647_v17  ;;  %v652_v18 = vsel %vm651_vm15, %v647_v17, 0.0 }
 0x456   : > { %v653_v53 = vrot.slane %v652_v18, 4 }
 0x457   : > { %v659_v16 = vsel %vm651_vm15, %v649_v12, 0.0 }
 0x458   : > { %v654_v20 = vadd.f32 %v653_v53, %v652_v18  ;;  %v660_v14 = vrot.slane %v659_v16, 4 }
 0x45a   : > { %v655_v54 = vrot.slane %v654_v20, 2  ;;  %v661_v11 = vadd.f32 %v660_v14, %v659_v16 }
 0x45c   : > { %v656_v22 = vadd.f32 %v655_v54, %v654_v20  ;;  %v662_v23 = vrot.slane %v661_v11, 2 }
 0x45e   : > { %v657_v24 = vrot.slane %v656_v22, 1  ;;  %v663_v13 = vadd.f32 %v662_v23, %v661_v11 }
 0x460   : > { %v658_v25 = vadd.f32 %v657_v24, %v656_v22  ;;  %v664_v29 = vrot.slane %v663_v13, 1 }
 0x462   : > { %v665_v26 = vadd.f32 %v664_v29, %v663_v13  ;;  %v666_v30 = vsel %vm591_vm0, %v658_v25, 0.0 }
 0x463   : > { %v791_v34 = vrot.slane %v666_v30, 4 }
 0x464   : > { %v667_v37 = vsel %vm592_vm1, %v665_v26, 0.0 }
 0x465   : > { %v792_v39 = vrot.slane %v667_v37, 4  ;;  %v801_v40 = vsel %vm629_vm2, %v791_v34, %v787_v4 }
 0x466   : > { %v803_v33 = vsel %vm630_vm12, %v801_v40, %v797_v35 }
 0x467   : > { %v802_v43 = vsel %vm629_vm2, %v792_v39, %v788_v8 }
 0x468   : > { %v804_v0 = vsel %vm630_vm12, %v802_v43, %v798_v21 }
 0x469   : > { %v807_v36 = vcombine.low %v803_v33, %v804_v0 }
 0x46b   : > { %809 = vst [vmem:[%s278_s23] sm:$0x77] %v807_v36 }
 0x46c PF: > { %s15_s18 = sadd.s32 1, %s987_s18  }
 0x46d   : > { %p12_p4 = scmp.ge.s32.totalorder %s15_s18, 4  }
 0x46f   :  { %14 = sbr.rel (!%p12_p4) target bundleno = 1 (0x1), region = 79 }

</bundles_post_ra>
